<compile_context>
chip_gen: v5e
topology: v5e:2x2
jax: 0.10.0
libtpu: 0.0.40
codegen_flags: <defaults>
</compile_context>

<pallas_src>
import jax
import jax.numpy as jnp
from jax import lax
from jax.experimental import pallas as pl
from jax.experimental.pallas import tpu as pltpu

NEG_SLOPE = 0.01


def _leaky_relu(x):
    # 2 VPU ops (mul + max) instead of 3 (mul + cmp + select).
    return jnp.maximum(x, NEG_SLOPE * x)


def actor_fwd_kernel(x_ref, w1_ref, b1_ref, w2_ref, b2_ref, w3_ref, b3_ref,
                     out_ref):
    h1 = _leaky_relu(
        jnp.dot(x_ref[...], w1_ref[...], preferred_element_type=jnp.float32)
        + b1_ref[...])
    h2 = _leaky_relu(
        jnp.dot(h1, w2_ref[...], preferred_element_type=jnp.float32)
        + b2_ref[...])
    logits = _leaky_relu(
        jnp.dot(h2, w3_ref[...], preferred_element_type=jnp.float32)
        + b3_ref[...])
    # One lane-dense (TB, 2A) store. exp only affects lanes >= A (the
    # log_std half); mu lanes pass through untouched. The mu/std split is a
    # free slice in the wrapper.
    n_act = out_ref.shape[-1] // 2
    col = lax.broadcasted_iota(jnp.int32, logits.shape, 1)
    out_ref[...] = jnp.where(col >= n_act, jnp.exp(logits), logits)


def _round_up(n, m):
    return ((n + m - 1) // m) * m


def actor_forward(x, params, *, max_batch_tile=512):
    """Runs the Actor forward pass in a single Pallas TPU kernel.

    Args:
      x: (B, s_size) float32 input.
      params: dict with w1 (s,h), b1 (1,h), w2 (h,h), b2 (1,h),
              w3 (h, 2*A), b3 (1, 2*A)  -- already transposed to (in, out).
    Returns:
      (mu, std), each (B, A).
    """
    B, s_size = x.shape
    two_a = params["w3"].shape[1]
    A = two_a // 2

    # Batch tile: multiple of 8 sublanes, capped at 512 rows. Grid over the
    # batch so weights stay VMEM-resident while x / out blocks pipeline.
    TB = min(max_batch_tile, _round_up(B, 8))
    B_pad = _round_up(B, TB)
    if B_pad != B:
        x = jnp.pad(x, ((0, B_pad - B), (0, 0)))
    grid = (B_pad // TB,)

    x_spec = pl.BlockSpec((TB, s_size), lambda i: (i, 0))
    out_spec = pl.BlockSpec((TB, two_a), lambda i: (i, 0))

    def resident(arr):
        # Full-array block, same index every grid step -> fetched once,
        # stays resident in VMEM across the batch loop.
        return pl.BlockSpec(arr.shape, lambda i: (0, 0))

    out = pl.pallas_call(
        actor_fwd_kernel,
        out_shape=jax.ShapeDtypeStruct((B_pad, two_a), jnp.float32),
        grid=grid,
        in_specs=[
            x_spec,
            resident(params["w1"]), resident(params["b1"]),
            resident(params["w2"]), resident(params["b2"]),
            resident(params["w3"]), resident(params["b3"]),
        ],
        out_specs=out_spec,
        compiler_params=pltpu.CompilerParams(
            dimension_semantics=("parallel",)),
    )(x, params["w1"], params["b1"], params["w2"], params["b2"],
      params["w3"], params["b3"])

    mu = out[:B, :A]
    std = out[:B, A:]
    return mu, std


def init_actor_params(key, s_size, h_size, no_of_action_types=4):
    """Deterministic param init mirroring nn.Linear shapes.

    torch Linear weight is (out, in); we store the transpose (in, out) so the
    kernel can do x @ W directly.
    """
    k1, k2, k3, k4, k5, k6 = jax.random.split(key, 6)

    def lin(kw, kb, fan_in, fan_out):
        bound = 1.0 / jnp.sqrt(fan_in)
        w = jax.random.uniform(kw, (fan_in, fan_out), jnp.float32, -bound, bound)
        b = jax.random.uniform(kb, (1, fan_out), jnp.float32, -bound, bound)
        return w, b

    w1, b1 = lin(k1, k2, s_size, h_size)
    w2, b2 = lin(k3, k4, h_size, h_size)
    w3, b3 = lin(k5, k6, h_size, no_of_action_types * 2)
    return {"w1": w1, "b1": b1, "w2": w2, "b2": b2, "w3": w3, "b3": b3}


def actor_forward_ref(x, p):
    """Pure-JAX reference for correctness checking."""
    def lrelu(v):
        return jnp.where(v > 0, v, NEG_SLOPE * v)
    h1 = lrelu(x @ p["w1"] + p["b1"])
    h2 = lrelu(h1 @ p["w2"] + p["b2"])
    logits = lrelu(h2 @ p["w3"] + p["b3"])
    A = logits.shape[1] // 2
    return logits[:, :A], jnp.exp(logits[:, A:])


if __name__ == "__main__":
    key = jax.random.PRNGKey(0)
    k_param, k_x = jax.random.split(key)

    batch = 8
    s_size = 16
    h_size = 32
    no_of_action_types = 4

    params = init_actor_params(k_param, s_size, h_size, no_of_action_types)
    x = jax.random.normal(k_x, (batch, s_size), jnp.float32)

    mu, std = actor_forward(x, params)
    jax.block_until_ready((mu, std))

    mu_ref, std_ref = actor_forward_ref(x, params)
    assert mu.shape == (batch, no_of_action_types)
    assert std.shape == (batch, no_of_action_types)
    assert jnp.allclose(mu, mu_ref, atol=1e-5, rtol=1e-5)
    assert jnp.allclose(std, std_ref, atol=1e-5, rtol=1e-5)

    # Also exercise a batch that triggers the padded/tiled path.
    big_b = 1030
    xb = jax.random.normal(jax.random.PRNGKey(1), (big_b, s_size), jnp.float32)
    mu_b, std_b = actor_forward(xb, params)
    jax.block_until_ready((mu_b, std_b))
    mu_br, std_br = actor_forward_ref(xb, params)
    assert jnp.allclose(mu_b, mu_br, atol=1e-5, rtol=1e-5)
    assert jnp.allclose(std_b, std_br, atol=1e-5, rtol=1e-5)

    print("KERNEL_OK")
</pallas_src>

<mosaic_0001>
module attributes {stable_mosaic.version = 11 : i64} {
  func.func @actor_fwd_kernel(%arg0: i32, %arg1: memref<8x16xf32, #tpu.memory_space<vmem>>, %arg2: memref<16x32xf32, #tpu.memory_space<vmem>>, %arg3: memref<1x32xf32, #tpu.memory_space<vmem>>, %arg4: memref<32x32xf32, #tpu.memory_space<vmem>>, %arg5: memref<1x32xf32, #tpu.memory_space<vmem>>, %arg6: memref<32x8xf32, #tpu.memory_space<vmem>>, %arg7: memref<1x8xf32, #tpu.memory_space<vmem>>, %arg8: memref<8x8xf32, #tpu.memory_space<vmem>>) attributes {dimension_semantics = [#tpu.dimension_semantics<parallel>], iteration_bounds = array<i64: 1>, scalar_prefetch = 0 : i64, scratch_operands = 0 : i64, tpu.core_type = #tpu.core_type<tc>, window_params = [{transform_indices = @transform_0, window_bounds = array<i64: 8, 16>}, {pipeline_mode = #tpu.pipeline_mode<synchronous>, transform_indices = @transform_1, window_bounds = array<i64: 16, 32>}, {pipeline_mode = #tpu.pipeline_mode<synchronous>, transform_indices = @transform_2, window_bounds = array<i64: 1, 32>}, {pipeline_mode = #tpu.pipeline_mode<synchronous>, transform_indices = @transform_3, window_bounds = array<i64: 32, 32>}, {pipeline_mode = #tpu.pipeline_mode<synchronous>, transform_indices = @transform_4, window_bounds = array<i64: 1, 32>}, {pipeline_mode = #tpu.pipeline_mode<synchronous>, transform_indices = @transform_5, window_bounds = array<i64: 32, 8>}, {pipeline_mode = #tpu.pipeline_mode<synchronous>, transform_indices = @transform_6, window_bounds = array<i64: 1, 8>}, {transform_indices = @transform_7, window_bounds = array<i64: 8, 8>}]} {
    %c0 = arith.constant 0 : index
    %c0_0 = arith.constant 0 : index
    %0 = vector.load %arg1[%c0, %c0_0] : memref<8x16xf32, #tpu.memory_space<vmem>>, vector<8x16xf32>
    %c0_1 = arith.constant 0 : index
    %c0_2 = arith.constant 0 : index
    %1 = vector.load %arg2[%c0_1, %c0_2] : memref<16x32xf32, #tpu.memory_space<vmem>>, vector<16x32xf32>
    %cst = arith.constant dense<0.000000e+00> : vector<8x32xf32>
    %2 = tpu.matmul %0, %1, %cst {dimension_numbers = #tpu.dot_dimension_numbers<[1], [0], [0], [1], [0, 0, 1, 1], [], []>} : vector<8x16xf32>, vector<16x32xf32>, vector<8x32xf32> -> vector<8x32xf32>
    %c0_3 = arith.constant 0 : index
    %c0_4 = arith.constant 0 : index
    %3 = vector.load %arg3[%c0_3, %c0_4] : memref<1x32xf32, #tpu.memory_space<vmem>>, vector<1x32xf32>
    %4 = vector.broadcast %3 : vector<1x32xf32> to vector<8x32xf32>
    %5 = arith.addf %2, %4 : vector<8x32xf32>
    %cst_5 = arith.constant 0.00999999977 : f32
    %6 = vector.broadcast %cst_5 : f32 to vector<8x32xf32>
    %7 = arith.mulf %6, %5 : vector<8x32xf32>
    %8 = arith.maximumf %5, %7 : vector<8x32xf32>
    %c0_6 = arith.constant 0 : index
    %c0_7 = arith.constant 0 : index
    %9 = vector.load %arg4[%c0_6, %c0_7] : memref<32x32xf32, #tpu.memory_space<vmem>>, vector<32x32xf32>
    %cst_8 = arith.constant dense<0.000000e+00> : vector<8x32xf32>
    %10 = tpu.matmul %8, %9, %cst_8 {dimension_numbers = #tpu.dot_dimension_numbers<[1], [0], [0], [1], [0, 0, 1, 1], [], []>} : vector<8x32xf32>, vector<32x32xf32>, vector<8x32xf32> -> vector<8x32xf32>
    %c0_9 = arith.constant 0 : index
    %c0_10 = arith.constant 0 : index
    %11 = vector.load %arg5[%c0_9, %c0_10] : memref<1x32xf32, #tpu.memory_space<vmem>>, vector<1x32xf32>
    %12 = vector.broadcast %11 : vector<1x32xf32> to vector<8x32xf32>
    %13 = arith.addf %10, %12 : vector<8x32xf32>
    %cst_11 = arith.constant 0.00999999977 : f32
    %14 = vector.broadcast %cst_11 : f32 to vector<8x32xf32>
    %15 = arith.mulf %14, %13 : vector<8x32xf32>
    %16 = arith.maximumf %13, %15 : vector<8x32xf32>
    %c0_12 = arith.constant 0 : index
    %c0_13 = arith.constant 0 : index
    %17 = vector.load %arg6[%c0_12, %c0_13] : memref<32x8xf32, #tpu.memory_space<vmem>>, vector<32x8xf32>
    %cst_14 = arith.constant dense<0.000000e+00> : vector<8x8xf32>
    %18 = tpu.matmul %16, %17, %cst_14 {dimension_numbers = #tpu.dot_dimension_numbers<[1], [0], [0], [1], [0, 0, 1, 1], [], []>} : vector<8x32xf32>, vector<32x8xf32>, vector<8x8xf32> -> vector<8x8xf32>
    %c0_15 = arith.constant 0 : index
    %c0_16 = arith.constant 0 : index
    %19 = vector.load %arg7[%c0_15, %c0_16] : memref<1x8xf32, #tpu.memory_space<vmem>>, vector<1x8xf32>
    %20 = vector.broadcast %19 : vector<1x8xf32> to vector<8x8xf32>
    %21 = arith.addf %18, %20 : vector<8x8xf32>
    %cst_17 = arith.constant 0.00999999977 : f32
    %22 = vector.broadcast %cst_17 : f32 to vector<8x8xf32>
    %23 = arith.mulf %22, %21 : vector<8x8xf32>
    %24 = arith.maximumf %21, %23 : vector<8x8xf32>
    %25 = tpu.iota {dimensions = array<i32: 1>} : vector<8x8xi32>
    %c4_i32 = arith.constant 4 : i32
    %26 = vector.broadcast %c4_i32 : i32 to vector<8x8xi32>
    %27 = arith.cmpi sge, %25, %26 : vector<8x8xi32>
    %28 = math.exp %24 : vector<8x8xf32>
    %29 = arith.select %27, %28, %24 : vector<8x8xi1>, vector<8x8xf32>
    %c0_18 = arith.constant 0 : index
    %c0_19 = arith.constant 0 : index
    %30 = vector.load %arg8[%c0_18, %c0_19] : memref<8x8xf32, #tpu.memory_space<vmem>>, vector<8x8xf32>
    tpu.vector_store %arg8[%c0_18, %c0_19], %29 {strides = array<i32>} : memref<8x8xf32, #tpu.memory_space<vmem>>, vector<8x8xf32>,
    return
  }
  func.func @transform_0(%arg0: i32) -> (i32, i32) {
    %c0_i32 = arith.constant 0 : i32
    %c0_i32_0 = arith.constant 0 : i32
    return %arg0, %c0_i32 : i32, i32
  }
  func.func @transform_1(%arg0: i32) -> (i32, i32) {
    %c0_i32 = arith.constant 0 : i32
    %c0_i32_0 = arith.constant 0 : i32
    %c0_i32_1 = arith.constant 0 : i32
    return %c0_i32, %c0_i32_0 : i32, i32
  }
  func.func @transform_2(%arg0: i32) -> (i32, i32) {
    %c0_i32 = arith.constant 0 : i32
    %c0_i32_0 = arith.constant 0 : i32
    %c0_i32_1 = arith.constant 0 : i32
    return %c0_i32, %c0_i32_0 : i32, i32
  }
  func.func @transform_3(%arg0: i32) -> (i32, i32) {
    %c0_i32 = arith.constant 0 : i32
    %c0_i32_0 = arith.constant 0 : i32
    %c0_i32_1 = arith.constant 0 : i32
    return %c0_i32, %c0_i32_0 : i32, i32
  }
  func.func @transform_4(%arg0: i32) -> (i32, i32) {
    %c0_i32 = arith.constant 0 : i32
    %c0_i32_0 = arith.constant 0 : i32
    %c0_i32_1 = arith.constant 0 : i32
    return %c0_i32, %c0_i32_0 : i32, i32
  }
  func.func @transform_5(%arg0: i32) -> (i32, i32) {
    %c0_i32 = arith.constant 0 : i32
    %c0_i32_0 = arith.constant 0 : i32
    %c0_i32_1 = arith.constant 0 : i32
    return %c0_i32, %c0_i32_0 : i32, i32
  }
  func.func @transform_6(%arg0: i32) -> (i32, i32) {
    %c0_i32 = arith.constant 0 : i32
    %c0_i32_0 = arith.constant 0 : i32
    %c0_i32_1 = arith.constant 0 : i32
    return %c0_i32, %c0_i32_0 : i32, i32
  }
  func.func @transform_7(%arg0: i32) -> (i32, i32) {
    %c0_i32 = arith.constant 0 : i32
    %c0_i32_0 = arith.constant 0 : i32
    return %arg0, %c0_i32 : i32, i32
  }
}

</mosaic_0001>

<bundles_post_ra>
// kernel: tpu_custom_call.1
= control target key start
LH: loop header
LB: loop body
LE: loop exit
PB: predicated region body
PF: predicated region fallthrough
CT: control target
= control target key end

     0   :  { %12 = vsyncpa [#allocation3], 0  ;;  %s320_s0 = inlined_call_operand.vmem [shape: f32[8,16], index: 0, kind: input, shape index: {}]   ;;  %s321_s1 = inlined_call_operand.hbm [shape: f32[16,32], index: 1, kind: input, shape index: {}]   ;;  %s322_s2 = inlined_call_operand.vmem [shape: f32[1,32], index: 2, kind: input, shape index: {}]   ;;  %s323_s3 = inlined_call_operand.vmem [shape: f32[32,32], index: 3, kind: input, shape index: {}]   ;;  %s324_s4 = inlined_call_operand.vmem [shape: f32[1,32], index: 4, kind: input, shape index: {}]   ;;  %s325_s5 = inlined_call_operand.vmem [shape: f32[32,8], index: 5, kind: input, shape index: {}]   ;;  %s326_s6 = inlined_call_operand.vmem [shape: f32[1,8], index: 6, kind: input, shape index: {}]   ;;  %s327_s7 = inlined_call_operand.hbm [shape: f32[8,8], index: 7, kind: output, shape index: {}]  }
   0x1   :  { %13 = vsyncpa [#allocation4], 0  ;;  %s20_s26 = sshll.u32 %s321_s1, 4  ;;  %s232_s27 = smov [#allocation2]   ;;  %s21_s26 = int_to_ptr.hbm [resolvable:$true] %s20_s26 }
   0x2   :  { %s22_s28 = sshll.u32 %s232_s27, 4  ;;  %s233_s29 = smov 128   ;;  %s23_s28 = int_to_ptr.vmem [resolvable:$true] %s22_s28 }
   0x3   :  { %s234_s30 = smov 8  }
   0x4   :  { %28 = dma.hbm_to_vmem [thread:$0]  %s21_s26, 256, %s23_s28, [#allocation3], %s233_s29, %s233_s29, %s234_s30  }
   0x5   :  { %228 = dma.done.wait [#allocation3], 256  }
   0x6   :  { %229 = vsyncadd [#allocation3], 4294967040  ;;  %v45_v0 = vld [vmem:[#allocation2 + $0x8] sm:$0xff]  ;;  %v44_v1 = vld [vmem:[#allocation2] sm:$0xff]  ;;  %vm50_vm0 = vcmask 130048   ;;  %vm84_vm1 = vcmask 261120   ;;  %v143_v26 = vlaneseq }
   0x7   :  { %68 = vmatpush.msra.mxu0 %v45_v0  ;;  %v43_v2 = vld [vmem:[%s320_s0] sm:$0xff]  ;;  %v79_v3 = vld [vmem:[%s323_s3 + $0x18] sm:$0xff]  ;;  %v78_v4 = vld [vmem:[%s323_s3 + $0x10] sm:$0xff]  ;;  %s158_s30 = sshll.u32 %s327_s7, 4  ;;  %vm149_vm3 = vcmask 64512   ;;  %s159_s30 = int_to_ptr.hbm [resolvable:$true] %s158_s30 }
   0x8   :  { %100 = vmatpush.msra.mxu1 %v79_v3  ;;  %v77_v5 = vld [vmem:[%s323_s3 + $0x8] sm:$0xff]  ;;  %v76_v6 = vld [vmem:[%s323_s3] sm:$0xff]  ;;  %v113_v12 = vld [vmem:[%s325_s5 + $0x18] sm:$0xff]  ;;  %v144_v28 = vand.u32 127, %v143_v26 }
   0x9   :  { %69 = vmatpush.msra.mxu0 %v44_v1  ;;  %v175_v7 = vld [vmem:[%s322_s2] ss:$0 sm:$0xff]  ;;  %133 = vmatpush.msra.mxu2 %v113_v12  ;;  %v112_v13 = vld [vmem:[%s325_s5 + $0x10] sm:$0xff]  ;;  %v111_v14 = vld [vmem:[%s325_s5 + $0x8] sm:$0xff] }
   0xa   :  { %168 = vmatmul.msk.f32.vlgmr.msra.gmra.mxu0 %vm50_vm0, %v43_v2  ;;  %101 = vmatpush.msra.mxu1 %v78_v4  ;;  %v110_v15 = vld [vmem:[%s325_s5] sm:$0xff]  ;;  %s235_s5 = smov [#allocation5]   ;;  %vm145_vm2 = vcmp.ge.s32.totalorder %v144_v28, 4 }
   0xb   :  { %134 = vmatpush.msra.mxu2 %v112_v13  ;;  %v176_v16 = vld [vmem:[%s324_s4] ss:$0 sm:$0xff]  ;;  %s156_s4 = sshll.u32 %s235_s5, 4  ;;  %s157_s4 = int_to_ptr.vmem [resolvable:$true] %s156_s4 }
   0xc   :  { %102 = vmatpush.msra.mxu1 %v77_v5  ;;  %v177_v21 = vld [vmem:[%s326_s6] ss:$0 sm:$0xff] }
   0xd   :  { %135 = vmatpush.msra.mxu2 %v111_v14 }
   0xe   :  { %103 = vmatpush.msra.mxu1 %v76_v6 }
   0xf   :  { %136 = vmatpush.msra.mxu2 %v110_v15 }
  0x87   :  { %v71_v8 = vpop.f32.mrf.mxu0 }
  0x88   :  { %v72_v9 = vadd.f32 %v175_v7, %v71_v8 }
  0x8a   :  { %v74_v10 = vmul.f32 0.01, %v72_v9 }
  0x8c   :  { %v75_v11 = vmax.f32 %v72_v9, %v74_v10 }
  0x8e   :  { %169 = vmatmul.msk.f32.vlgmr.msra.gmra.mxu1 %vm84_vm1, %v75_v11 }
 0x10b   :  { %v105_v17 = vpop.f32.mrf.mxu1 }
 0x10c   :  { %v106_v18 = vadd.f32 %v176_v16, %v105_v17 }
 0x10e   :  { %v108_v19 = vmul.f32 0.01, %v106_v18 }
 0x110   :  { %v109_v20 = vmax.f32 %v106_v18, %v108_v19 }
 0x112   :  { %170 = vmatmul.msk.f32.vlgmr.msra.gmra.mxu2 %vm84_vm1, %v109_v20 }
 0x195   :  { %v138_v22 = vpop.f32.mrf.mxu2 }
 0x196   :  { %v139_v23 = vadd.f32 %v177_v21, %v138_v22 }
 0x198   :  { %v141_v24 = vmul.f32 0.01, %v139_v23 }
 0x19a   :  { %v142_v25 = vmax.f32 %v139_v23, %v141_v24 }
 0x19c   :  { %v146_v27 = vmul.f32 1.442695, %v142_v25 }
 0x19e   :  { %178 = vpow2.f32 %v146_v27 }
 0x1a4   :  { %v179_v29 = vpop.eup %178 }
 0x1a5   :  { %v148_v30 = vsel %vm145_vm2, %v179_v29, %v142_v25 }
 0x1a6   :  { %150 = vst.msk [vmem:[#allocation5] sm:$0xff] %vm149_vm3, %v148_v30 }
 0x1a7   :  { %161 = dma.vmem_to_hbm [thread:$0]  %s157_s4, 128, %s159_s30, [#allocation4]  }
 0x1a8   :  { %230 = dma.done.wait [#allocation4], 128  }
 0x1a9   :  { %231 = vsyncadd [#allocation4], 4294967168 }
 0x1aa   :  { %166 = vsyncpa [#allocation3], 1 }
 0x1ab   :  { %167 = vsyncpa [#allocation4], 1 }

</bundles_post_ra>
